<compile_context>
chip_gen: v7x
topology: tpu7x:2x2x1
jax: 0.10.0
libtpu: 0.0.40
codegen_flags: <defaults>
</compile_context>

<pallas_src>
import functools

import jax
import jax.numpy as jnp
from jax.experimental import pallas as pl
from jax.experimental.pallas import tpu as pltpu


# --------------------------------------------------------------------------
# Kernel 1: projection  Wh = h @ W_pad ,  f = h @ Wa   (Wa = W @ [a1 | a2])
# --------------------------------------------------------------------------
def _proj_kernel(h_ref, w_ref, wa_ref, wh_ref, f_ref, *, mm_dtype):
    h = h_ref[...].astype(mm_dtype)
    w = w_ref[...].astype(mm_dtype)
    wa = wa_ref[...].astype(mm_dtype)
    wh = jnp.dot(h, w, preferred_element_type=jnp.float32)
    wh_ref[...] = wh.astype(wh_ref.dtype)
    # Folded attention features: (hW)a == h(Wa); keeps logits in f32.
    f_ref[...] = jnp.dot(h, wa, preferred_element_type=jnp.float32)


# --------------------------------------------------------------------------
# Kernel 2: masked attention with online softmax + aggregation + ELU
#   grid = (num_q_blocks, num_k_blocks);  k axis is the reduction axis.
# --------------------------------------------------------------------------
def _attn_kernel(f1_ref, f2_ref, wh_ref, adj_ref, out_ref,
                 m_ref, l_ref, acc_ref, *, alpha):
    ki = pl.program_id(1)

    @pl.when(ki == 0)
    def _init():
        m_ref[...] = jnp.full(m_ref.shape, -jnp.inf, jnp.float32)
        l_ref[...] = jnp.zeros(l_ref.shape, jnp.float32)
        acc_ref[...] = jnp.zeros(acc_ref.shape, jnp.float32)

    # Attention logits for this (query-block, key-block) tile.
    e = f1_ref[...] + f2_ref[...]                      # [TQ, TK]  (f32)
    e = jnp.where(e > 0, e, alpha * e)                 # LeakyReLU
    att = jnp.where(adj_ref[...] != 0, e, -9.0e15)     # adjacency mask

    # Online softmax update.
    m_prev = m_ref[...]
    m_new = jnp.maximum(m_prev, jnp.max(att, axis=1, keepdims=True))
    corr = jnp.exp(m_prev - m_new)
    p = jnp.exp(att - m_new)
    l_ref[...] = corr * l_ref[...] + jnp.sum(p, axis=1, keepdims=True)
    wh = wh_ref[...]                                   # [TK, F_pad]
    acc_ref[...] = corr * acc_ref[...] + jnp.dot(
        p.astype(wh.dtype), wh, preferred_element_type=jnp.float32)
    m_ref[...] = m_new

    @pl.when(ki == pl.num_programs(1) - 1)
    def _finalize():
        l = l_ref[...]
        inv_l = pl.reciprocal(l, approx=True)          # EUP slot
        inv_l = inv_l * (2.0 - l * inv_l)              # one Newton step -> f32 acc.
        h_prime = acc_ref[...] * inv_l
        # ELU (safe form: exp argument clamped to <= 0).
        out_ref[...] = jnp.where(
            h_prime > 0.0, h_prime,
            jnp.exp(jnp.minimum(h_prime, 0.0)) - 1.0).astype(out_ref.dtype)


# --------------------------------------------------------------------------
# Wrapper
# --------------------------------------------------------------------------
def _pick_block(n, preferred, align):
    """Largest divisor of n that is <= preferred and a multiple of align, else n."""
    if n % align != 0:
        return n
    b = min(preferred, n)
    b -= b % align
    while b >= align:
        if n % b == 0:
            return b
        b -= align
    return n


def gat_layer(h, adj, W, a, *, alpha=0.2, block_q=128, block_k=128,
              matmul_dtype=None):
    """Pallas GAT layer forward (concat=True, eval mode).

    block_q / block_k: query-row / key-column tile sizes.  For large graphs
    prefer block_k of 256-512 (tiles are small relative to 32/64 MiB VMEM).
    matmul_dtype: dtype fed to the MXU (f32 accumulation).  Pass jnp.bfloat16
    on v6e/v7x for ~2x MXU throughput and half the Wh HBM traffic.
    """
    N, in_features = h.shape
    F = W.shape[1]
    if matmul_dtype is None:
        matmul_dtype = h.dtype
    alpha = float(alpha)

    # Lane-dense feature dim: pad out_features up to a multiple of 128 so both
    # matmul output columns and the final stores are unmasked / full width.
    F_pad = max(128, ((F + 127) // 128) * 128)
    W_pad = jnp.zeros((in_features, F_pad), W.dtype).at[:, :F].set(W)

    # Fold the attention vector into the weights: (hW)a == h(Wa).
    Wa = jnp.dot(W, jnp.concatenate([a[:F, :], a[F:, :]], axis=1))   # [in_f, 2]
    Wa = Wa.astype(jnp.float32)

    # int8 adjacency mask: the N^2 stream dominates HBM traffic at real sizes.
    adj_mask = (adj > 0).astype(jnp.int8)

    TQ = _pick_block(N, block_q, 8)
    TK = _pick_block(N, block_k, 128)
    wh_dtype = jnp.dtype(matmul_dtype)

    # ---- kernel 1: projection --------------------------------------------
    wh, f = pl.pallas_call(
        functools.partial(_proj_kernel, mm_dtype=matmul_dtype),
        out_shape=(jax.ShapeDtypeStruct((N, F_pad), wh_dtype),
                   jax.ShapeDtypeStruct((N, 2), jnp.float32)),
        grid_spec=pltpu.PrefetchScalarGridSpec(
            num_scalar_prefetch=0,
            grid=(N // TQ,),
            in_specs=[
                pl.BlockSpec((TQ, in_features), lambda i: (i, 0)),
                pl.BlockSpec((in_features, F_pad), lambda i: (0, 0)),
                pl.BlockSpec((in_features, 2), lambda i: (0, 0)),
            ],
            out_specs=[
                pl.BlockSpec((TQ, F_pad), lambda i: (i, 0)),
                pl.BlockSpec((TQ, 2), lambda i: (i, 0)),
            ]),
        compiler_params=pltpu.CompilerParams(
            dimension_semantics=("parallel",),
            vmem_limit_bytes=32 * 1024 * 1024),
    )(h, W_pad, Wa)

    # Layout plumbing outside the kernels: f1 stays a column vector, f2 becomes
    # a lane-major [1, N] row so no per-tile transpose happens inside kernel 2.
    f1 = f[:, 0:1]                       # [N, 1]
    f2_row = f[:, 1].reshape(1, N)       # [1, N]

    # ---- kernel 2: masked online-softmax attention + aggregation ----------
    out = pl.pallas_call(
        functools.partial(_attn_kernel, alpha=alpha),
        out_shape=jax.ShapeDtypeStruct((N, F_pad), jnp.float32),
        grid_spec=pltpu.PrefetchScalarGridSpec(
            num_scalar_prefetch=0,
            grid=(N // TQ, N // TK),
            in_specs=[
                pl.BlockSpec((TQ, 1), lambda qi, ki: (qi, 0)),       # f1 (queries)
                pl.BlockSpec((1, TK), lambda qi, ki: (0, ki)),       # f2 (keys, row)
                pl.BlockSpec((TK, F_pad), lambda qi, ki: (ki, 0)),   # Wh (keys)
                pl.BlockSpec((TQ, TK), lambda qi, ki: (qi, ki)),     # adj mask int8
            ],
            out_specs=pl.BlockSpec((TQ, F_pad), lambda qi, ki: (qi, 0)),
            scratch_shapes=[
                pltpu.VMEM((TQ, 1), jnp.float32),       # running max
                pltpu.VMEM((TQ, 1), jnp.float32),       # running sum
                pltpu.VMEM((TQ, F_pad), jnp.float32),   # output accumulator
            ]),
        compiler_params=pltpu.CompilerParams(
            dimension_semantics=("parallel", "arbitrary"),
            vmem_limit_bytes=32 * 1024 * 1024),
    )(f1, f2_row, wh, adj_mask)

    if F_pad != F:
        out = out[:, :F]
    return out


# --------------------------------------------------------------------------
# Helpers for the demo / correctness check
# --------------------------------------------------------------------------
def _xavier_uniform(key, shape, gain):
    fan_in, fan_out = shape[0], shape[1]
    bound = gain * jnp.sqrt(6.0 / (fan_in + fan_out))
    return jax.random.uniform(key, shape, jnp.float32, -bound, bound)


def _reference(h, adj, W, a, alpha):
    F_out = W.shape[1]
    Wh = h @ W
    f1 = Wh @ a[:F_out]
    f2 = Wh @ a[F_out:]
    e = f1 + f2.T
    e = jnp.where(e > 0, e, alpha * e)
    att = jnp.where(adj > 0, e, -9.0e15)
    att = jax.nn.softmax(att, axis=1)
    hp = att @ Wh
    return jax.nn.elu(hp)


if __name__ == "__main__":
    # Small but tiling-exercising configuration: grid (2, 2) with 128x128 tiles.
    N, in_features, out_features = 256, 64, 32
    alpha = 0.2
    gain = 1.414

    key = jax.random.PRNGKey(0)
    k_h, k_adj, k_W, k_a = jax.random.split(key, 4)

    h = jax.random.normal(k_h, (N, in_features), jnp.float32)
    adj = (jax.random.uniform(k_adj, (N, N)) > 0.7).astype(jnp.float32)
    adj = jnp.maximum(adj, jnp.eye(N, dtype=jnp.float32))   # self loops

    W = _xavier_uniform(k_W, (in_features, out_features), gain)
    a = _xavier_uniform(k_a, (2 * out_features, 1), gain)

    ref = _reference(h, adj, W, a, alpha)

    # f32 MXU path — tight tolerance against the pure-JAX reference.
    out = gat_layer(h, adj, W, a, alpha=alpha)
    out = jax.block_until_ready(out)
    assert out.shape == (N, out_features)
    assert jnp.allclose(out, ref, atol=1e-4, rtol=1e-4), (
        f"f32 max err {jnp.max(jnp.abs(out - ref))}")

    # bf16 MXU-input path (f32 accumulation) — looser tolerance.
    out_bf16 = gat_layer(h, adj, W, a, alpha=alpha, matmul_dtype=jnp.bfloat16)
    out_bf16 = jax.block_until_ready(out_bf16)
    assert out_bf16.shape == (N, out_features)
    assert jnp.allclose(out_bf16, ref, atol=1.5e-1, rtol=1.5e-1), (
        f"bf16 max err {jnp.max(jnp.abs(out_bf16 - ref))}")

    print("KERNEL_OK")
</pallas_src>

<mosaic_0001>
module attributes {stable_mosaic.version = 11 : i64} {
  func.func @_proj_kernel(%arg0: i32, %arg1: memref<128x64xf32, #tpu.memory_space<vmem>>, %arg2: memref<64x128xf32, #tpu.memory_space<vmem>>, %arg3: memref<64x2xf32, #tpu.memory_space<vmem>>, %arg4: memref<128x128xf32, #tpu.memory_space<vmem>>, %arg5: memref<128x2xf32, #tpu.memory_space<vmem>>) attributes {dimension_semantics = [#tpu.dimension_semantics<parallel>], iteration_bounds = array<i64: 2>, scalar_prefetch = 0 : i64, scratch_operands = 0 : i64, tpu.core_type = #tpu.core_type<tc>, window_params = [{transform_indices = @transform_0, window_bounds = array<i64: 128, 64>}, {pipeline_mode = #tpu.pipeline_mode<synchronous>, transform_indices = @transform_1, window_bounds = array<i64: 64, 128>}, {pipeline_mode = #tpu.pipeline_mode<synchronous>, transform_indices = @transform_2, window_bounds = array<i64: 64, 2>}, {transform_indices = @transform_3, window_bounds = array<i64: 128, 128>}, {transform_indices = @transform_4, window_bounds = array<i64: 128, 2>}]} {
    %c0 = arith.constant 0 : index
    %c0_0 = arith.constant 0 : index
    %0 = vector.load %arg1[%c0, %c0_0] : memref<128x64xf32, #tpu.memory_space<vmem>>, vector<128x64xf32>
    %c0_1 = arith.constant 0 : index
    %c0_2 = arith.constant 0 : index
    %1 = vector.load %arg2[%c0_1, %c0_2] : memref<64x128xf32, #tpu.memory_space<vmem>>, vector<64x128xf32>
    %c0_3 = arith.constant 0 : index
    %c0_4 = arith.constant 0 : index
    %2 = vector.load %arg3[%c0_3, %c0_4] : memref<64x2xf32, #tpu.memory_space<vmem>>, vector<64x2xf32>
    %cst = arith.constant dense<0.000000e+00> : vector<128x128xf32>
    %3 = tpu.matmul %0, %1, %cst {dimension_numbers = #tpu.dot_dimension_numbers<[1], [0], [0], [1], [0, 0, 1, 1], [], []>} : vector<128x64xf32>, vector<64x128xf32>, vector<128x128xf32> -> vector<128x128xf32>
    %c0_5 = arith.constant 0 : index
    %c0_6 = arith.constant 0 : index
    %4 = vector.load %arg4[%c0_5, %c0_6] : memref<128x128xf32, #tpu.memory_space<vmem>>, vector<128x128xf32>
    tpu.vector_store %arg4[%c0_5, %c0_6], %3 {strides = array<i32>} : memref<128x128xf32, #tpu.memory_space<vmem>>, vector<128x128xf32>,
    %cst_7 = arith.constant dense<0.000000e+00> : vector<128x2xf32>
    %5 = tpu.matmul %0, %2, %cst_7 {dimension_numbers = #tpu.dot_dimension_numbers<[1], [0], [0], [1], [0, 0, 1, 1], [], []>} : vector<128x64xf32>, vector<64x2xf32>, vector<128x2xf32> -> vector<128x2xf32>
    %c0_8 = arith.constant 0 : index
    %c0_9 = arith.constant 0 : index
    %6 = vector.load %arg5[%c0_8, %c0_9] : memref<128x2xf32, #tpu.memory_space<vmem>>, vector<128x2xf32>
    tpu.vector_store %arg5[%c0_8, %c0_9], %5 {strides = array<i32>} : memref<128x2xf32, #tpu.memory_space<vmem>>, vector<128x2xf32>,
    return
  }
  func.func @transform_0(%arg0: i32) -> (i32, i32) {
    %c0_i32 = arith.constant 0 : i32
    %c0_i32_0 = arith.constant 0 : i32
    return %arg0, %c0_i32 : i32, i32
  }
  func.func @transform_1(%arg0: i32) -> (i32, i32) {
    %c0_i32 = arith.constant 0 : i32
    %c0_i32_0 = arith.constant 0 : i32
    %c0_i32_1 = arith.constant 0 : i32
    return %c0_i32, %c0_i32_0 : i32, i32
  }
  func.func @transform_2(%arg0: i32) -> (i32, i32) {
    %c0_i32 = arith.constant 0 : i32
    %c0_i32_0 = arith.constant 0 : i32
    %c0_i32_1 = arith.constant 0 : i32
    return %c0_i32, %c0_i32_0 : i32, i32
  }
  func.func @transform_3(%arg0: i32) -> (i32, i32) {
    %c0_i32 = arith.constant 0 : i32
    %c0_i32_0 = arith.constant 0 : i32
    return %arg0, %c0_i32 : i32, i32
  }
  func.func @transform_4(%arg0: i32) -> (i32, i32) {
    %c0_i32 = arith.constant 0 : i32
    %c0_i32_0 = arith.constant 0 : i32
    return %arg0, %c0_i32 : i32, i32
  }
}

</mosaic_0001>

<bundles_post_ra>
// kernel: tpu_custom_call.1
= control target key start
LH: loop header
LB: loop body
LE: loop exit
PB: predicated region body
PF: predicated region fallthrough
CT: control target
= control target key end

     0   :  { %10 = vsyncpa [#allocation3], 0  ;;  %s1334_s0 = inlined_call_operand.vmem [shape: f32[256,64], index: 0, kind: input, shape index: {}]   ;;  %s1335_s1 = inlined_call_operand.vmem [shape: f32[64,128], index: 1, kind: input, shape index: {}]   ;;  %s1336_s2 = inlined_call_operand.vmem [shape: f32[64,2], index: 2, kind: input, shape index: {}]   ;;  %s1337_s3 = inlined_call_operand.hbm [shape: f32[256,128], index: 3, kind: output, shape index: {0}]   ;;  %s1338_s4 = inlined_call_operand.vmem [shape: f32[256,2], index: 4, kind: output, shape index: {1}]  }
   0x1   :  { %12 = vsyncpa [#allocation3 + $0x1], 0  ;;  %s1067_s15 = smov 0   ;;  %s1069_s16 = smov 0  }
   0x2   :  { %s1071_s17 = smov 0   ;;  %s1073_s18 = smov 0  }
   0x3 LB: > { %s1088_s19 = sadd.s32 4294967295, %s1037_s18   ;;  %s727_s20 = sadd.s32 4294967294, %s1037_s18   ;;  %s1037_s18 = sphi %s1073_s18, %s1344_s18   ;;  %s1033_s17 = sphi %s1071_s17, %s1343_s17   ;;  %s1029_s16 = sphi %s1069_s16, %s1342_s16   ;;  %s1025_s15 = sphi %s1067_s15, %s1341_s15  }
   0x4   : > { %s1092_s21 = sadd.s32 1, %s1037_s18   ;;  %s93_s22 = sadd.s32 1, %s1033_s17 }
   0x5   : > { %s90_s23 = ssub.s32 %s1037_s18, %s1092_s21  ;;  %p103_p0 = scmp.ne.s32.totalorder %s1033_s17, %s1029_s16 }
   0x6   : > { %p91_p1 = scmp.eq.s32.totalorder %s90_s23, 0  ;;  %p104_p2 = scmp.eq.s32.totalorder %s1088_s19, 1 }
   0x7   : > { %p109_p3 = scmp.ne.s32.totalorder %s1029_s16, %s1025_s15  ;;  %p110_p4 = scmp.eq.s32.totalorder %s727_s20, 1 }
   0x8   : > { %s1103_s24 = scalar_select %p91_p1, %s1033_s17, %s93_s22  }
   0x9   : > { %p1105_p5 = por %p104_p2, %p103_p0  ;;  %p1109_p6 = por %p110_p4, %p109_p3 }
   0xa   : > { %p730_p7 = scmp.ge.s32.totalorder %s1037_s18, 1  ;;  %p169_p8 = scmp.lt.s32.totalorder %s1037_s18, 3 }
   0xc   : > { %p170_p9 = pnand %p730_p7, %p169_p8 }
   0xd   : > { %v229_v0 = vld [vmem:[%s1335_s1] sm:$0xff] (!%p170_p9)  ;;  %v230_v1 = vld [vmem:[%s1335_s1 + $0x8] sm:$0xff] (!%p170_p9)  ;;  %s732_s7 = sshll.u32 (!%p170_p9), %s1088_s19, 4  ;;  %v231_v5 = vld [vmem:[%s1335_s1 + $0x10] sm:$0xff] (!%p170_p9)  ;;  %vm245_vm0 = vcmask (!%p170_p9), 523264   ;;  %s190_s5 = sand.u32 (!%p170_p9), 1, %s1029_s16  }
   0xe   : > { %173 = sbr.rel (%p170_p9) target bundleno = 289 (0x121), region = 32  ;;  %v237_v2 = vld [vmem:[%s1336_s2] sm:$0xff] (!%p170_p9)  ;;  %v902_v3 = vpack.c.bf16 (!%p170_p9), %v230_v1, %v229_v0  ;;  %v238_v4 = vld [vmem:[%s1336_s2 + $0x8] sm:$0xff] (!%p170_p9)  ;;  %v232_v6 = vld [vmem:[%s1335_s1 + $0x18] sm:$0xff] (!%p170_p9)  ;;  %p201_p10 = scmp.lt.s32.totalorder (!%p170_p9), %s732_s7, 31  ;;  %vm600_vm1 = vcmask (!%p170_p9), 15360  }
   0xf   : > { %v918_v7 = vpack.c.bf16 (!%p170_p9), %v238_v4, %v237_v2  ;;  %v906_v8 = vpack.c.bf16 (!%p170_p9), %v232_v6, %v231_v5  ;;  %v239_v9 = vld [vmem:[%s1336_s2 + $0x10] sm:$0xff] (!%p170_p9)  ;;  %v240_v10 = vld [vmem:[%s1336_s2 + $0x18] sm:$0xff] (!%p170_p9)  ;;  %v233_v11 = vld [vmem:[%s1335_s1 + $0x20] sm:$0xff] (!%p170_p9)  ;;  %s731_s6 = sshll.u32 (!%p170_p9), %s190_s5, 7 }
  0x10   : > { %903 = vmatprep.subr.bf16.mxu0 (!%p170_p9), %v902_v3  ;;  %v922_v12 = vpack.c.bf16 (!%p170_p9), %v240_v10, %v239_v9  ;;  %v234_v13 = vld [vmem:[%s1335_s1 + $0x28] sm:$0xff] (!%p170_p9)  ;;  %v241_v14 = vld [vmem:[%s1336_s2 + $0x20] sm:$0xff] (!%p170_p9)  ;;  %v235_v18 = vld [vmem:[%s1335_s1 + $0x30] sm:$0xff] (!%p170_p9)  ;;  %s1232_s12 = scalar_lea.vmem (!%p170_p9), [#allocation2], %s731_s6 }
  0x11   : > { %v242_v15 = vld [vmem:[%s1336_s2 + $0x28] sm:$0xff] (!%p170_p9)  ;;  %919 = vmatprep.subr.bf16.mxu1 (!%p170_p9), %v918_v7  ;;  %905 = vmatpush3.bf16.msra.mxu0 (!%p170_p9), %v902_v3  ;;  %v910_v16 = vpack.c.bf16 (!%p170_p9), %v234_v13, %v233_v11  ;;  %v236_v19 = vld [vmem:[%s1335_s1 + $0x38] sm:$0xff] (!%p170_p9)  ;;  %v243_v20 = vld [vmem:[%s1336_s2 + $0x30] sm:$0xff] (!%p170_p9) }
  0x12   : > { %921 = vmatpush3.bf16.msra.mxu1 (!%p170_p9), %v918_v7  ;;  %907 = vmatprep.subr.bf16.mxu0 (!%p170_p9), %v906_v8  ;;  %v926_v17 = vpack.c.bf16 (!%p170_p9), %v242_v15, %v241_v14  ;;  %v244_v21 = vld [vmem:[%s1336_s2 + $0x38] sm:$0xff] (!%p170_p9)  ;;  %v914_v23 = vpack.c.bf16 (!%p170_p9), %v236_v19, %v235_v18 }
  0x13   : > { %923 = vmatprep.subr.bf16.mxu1 (!%p170_p9), %v922_v12  ;;  %v930_v24 = vpack.c.bf16 (!%p170_p9), %v244_v21, %v243_v20 }
  0x15   : > { %s1346_s7 = smov (!%p201_p10, %s732_s7), 31  ;;  %909 = vmatpush3.bf16.msra.mxu0 %v906_v8 }
  0x16   : > { %s733_s10 = sshll.u32 %s1346_s7, 3  ;;  %925 = vmatpush3.bf16.msra.mxu1 %v922_v12  ;;  %911 = vmatprep.subr.bf16.mxu0 %v910_v16  ;;  %s773_s7 = sshll.u32 %s1088_s19, 11 }
  0x17   : > { %s1166_s23 = scalar_lea.vmem %s1334_s0, %s733_s10  ;;  %927 = vmatprep.subr.bf16.mxu1 %v926_v17  ;;  %s1230_s11 = scalar_lea.vmem %s1338_s4, %s733_s10 }
  0x18   : > { %v213_v22 = vld [vmem:[%s1166_s23] sm:$0xff]  ;;  %v214_v25 = vld [vmem:[%s1166_s23 + $0x8] sm:$0xff]  ;;  %v215_v26 = vld [vmem:[%s1166_s23 + $0x10] sm:$0xff]  ;;  %s636_s10 = sshll.u32 %s1232_s12, 4  ;;  %s1281_s20 = scalar_lea.hbm %s1337_s3, %s773_s7  ;;  %s1283_s10 = int_to_ptr.vmem [resolvable:$true] %s636_s10 }
  0x19   : > { %838 = vmatprep.mubr.msk.f32.mxu0 %vm245_vm0, %v213_v22  ;;  %878 = vmatprep.mubr.msk.f32.mxu1 %vm245_vm0, %v213_v22  ;;  %v216_v27 = vld [vmem:[%s1166_s23 + $0x18] sm:$0xff]  ;;  %v217_v28 = vld [vmem:[%s1166_s23 + $0x20] sm:$0xff]  ;;  %v218_v29 = vld [vmem:[%s1166_s23 + $0x28] sm:$0xff]  ;;  %s1293_s19 = scalar_lea.sflag [#allocation3], %s190_s5  ;;  %s975_s22 = scalar_lea.vmem %s1283_s10, 2048 }
  0x1a   : > { %913 = vmatpush3.bf16.msra.mxu0 %v910_v16  ;;  %929 = vmatpush3.bf16.msra.mxu1 %v926_v17  ;;  %v219_v30 = vld [vmem:[%s1166_s23 + $0x30] sm:$0xff]  ;;  %v220_v31 = vld [vmem:[%s1166_s23 + $0x38] sm:$0xff]  ;;  %v221_v32 = vld [vmem:[%s1166_s23 + $0x40] sm:$0xff]  ;;  %p976_p11 = scmp.ne.s32.totalorder %s1283_s10, %s975_s22 }
  0x1b   : > { %915 = vmatprep.subr.bf16.mxu0 %v914_v23  ;;  %931 = vmatprep.subr.bf16.mxu1 %v930_v24  ;;  %v222_v33 = vld [vmem:[%s1166_s23 + $0x48] sm:$0xff]  ;;  %v223_v34 = vld [vmem:[%s1166_s23 + $0x50] sm:$0xff]  ;;  %v224_v35 = vld [vmem:[%s1166_s23 + $0x58] sm:$0xff] }
  0x1c   : > { %v225_v36 = vld [vmem:[%s1166_s23 + $0x60] sm:$0xff]  ;;  %v226_v37 = vld [vmem:[%s1166_s23 + $0x68] sm:$0xff]  ;;  %v227_v38 = vld [vmem:[%s1166_s23 + $0x70] sm:$0xff]  ;;  %p977_p12 = pnand %p976_p11, %p1105_p5 }
  0x1d   : > { %v228_v39 = vld [vmem:[%s1166_s23 + $0x78] sm:$0xff]  ;;  %s1039_s23 = smov [#allocation2]  }
  0x1e   : > { %917 = vmatpush3.bf16.msra.mxu0 %v914_v23  ;;  %933 = vmatpush3.bf16.msra.mxu1 %v930_v24  ;;  %p978_p13 = pneg %p977_p12  ;;  %s979_s27 = sshll.u32 %s1039_s23, 4  ;;  %s980_s27 = int_to_ptr.vmem [resolvable:$false] %s979_s27 }
  0x1f   : > { %s981_s28 = scalar_lea.vmem %s980_s27, 4096  ;;  %p982_p0 = scmp.lt.s32.totalorder %s1283_s10, %s980_s27 }
  0x20   : > { %p983_p1 = scmp.lt.s32.totalorder %s981_s28, %s975_s22 }
  0x21   : > { %839 = vmatmul.mubr.msk.f32.vlgmr.msra.gmra.mrb[0].mxu0 %vm245_vm0, %v214_v25  ;;  %879 = vmatmul.mubr.msk.f32.vlgmr.msra.gmra.mrb[0].mxu1 %vm245_vm0, %v214_v25 }
  0x22   : > { %841 = vmatprep.mubr.msk.f32.mxu0 %vm245_vm0, %v215_v26  ;;  %881 = vmatprep.mubr.msk.f32.mxu1 %vm245_vm0, %v215_v26  ;;  %p984_p2 = por %p983_p1, %p982_p0 }
  0x24   : > { %p985_p3 = pnand %p984_p2, %p978_p13 }
  0x25   : > { %842 = vmatmul.mubr.msk.f32.gmra.mrb[2].mxu0 %vm245_vm0, %v216_v27  ;;  %882 = vmatmul.mubr.msk.f32.gmra.mrb[2].mxu1 %vm245_vm0, %v216_v27 }
  0x26   : > { %844 = vmatprep.mubr.msk.f32.mxu0 %vm245_vm0, %v217_v28  ;;  %884 = vmatprep.mubr.msk.f32.mxu1 %vm245_vm0, %v217_v28 }
  0x29   : > { %845 = vmatmul.mubr.msk.f32.gmra.mrb[4].mxu0 %vm245_vm0, %v218_v29  ;;  %885 = vmatmul.mubr.msk.f32.gmra.mrb[4].mxu1 %vm245_vm0, %v218_v29 }
  0x2a   : > { %847 = vmatprep.mubr.msk.f32.mxu0 %vm245_vm0, %v219_v30  ;;  %887 = vmatprep.mubr.msk.f32.mxu1 %vm245_vm0, %v219_v30 }
  0x2d   : > { %848 = vmatmul.mubr.msk.f32.gmra.mrb[6].mxu0 %vm245_vm0, %v220_v31  ;;  %888 = vmatmul.mubr.msk.f32.gmra.mrb[6].mxu1 %vm245_vm0, %v220_v31 }
  0x2e   : > { %850 = vmatprep.mubr.msk.f32.mxu0 %vm245_vm0, %v221_v32  ;;  %890 = vmatprep.mubr.msk.f32.mxu1 %vm245_vm0, %v221_v32 }
  0x31   : > { %851 = vmatmul.mubr.msk.f32.gmra.mrb[8].mxu0 %vm245_vm0, %v222_v33  ;;  %891 = vmatmul.mubr.msk.f32.gmra.mrb[8].mxu1 %vm245_vm0, %v222_v33 }
  0x32   : > { %853 = vmatprep.mubr.msk.f32.mxu0 %vm245_vm0, %v223_v34  ;;  %893 = vmatprep.mubr.msk.f32.mxu1 %vm245_vm0, %v223_v34 }
  0x35   : > { %854 = vmatmul.mubr.msk.f32.gmra.mrb[10].mxu0 %vm245_vm0, %v224_v35  ;;  %894 = vmatmul.mubr.msk.f32.gmra.mrb[10].mxu1 %vm245_vm0, %v224_v35 }
  0x36   : > { %856 = vmatprep.mubr.msk.f32.mxu0 %vm245_vm0, %v225_v36  ;;  %896 = vmatprep.mubr.msk.f32.mxu1 %vm245_vm0, %v225_v36 }
  0x39   : > { %857 = vmatmul.mubr.msk.f32.gmra.mrb[12].mxu0 %vm245_vm0, %v226_v37  ;;  %897 = vmatmul.mubr.msk.f32.gmra.mrb[12].mxu1 %vm245_vm0, %v226_v37 }
  0x3a   : > { %859 = vmatprep.mubr.msk.f32.mxu0 %vm245_vm0, %v227_v38  ;;  %899 = vmatprep.mubr.msk.f32.mxu1 %vm245_vm0, %v227_v38 }
  0x3d   : > { %860 = vmatmul.mubr.msk.f32.gmra.mrb[14].mxu0 %vm245_vm0, %v228_v39  ;;  %900 = vmatmul.mubr.msk.f32.gmra.mrb[14].mxu1 %vm245_vm0, %v228_v39 }
  0xf4   : > { %v840_v40 = vpop.f32.mrb[0].mxu0  ;;  %v880_v41 = vpop.f32.mrb[0].mxu1 }
  0xf5   : > { %440 = vst [vmem:[%s1232_s12 + $0x8] sm:$0xff] %v840_v40  ;;  %v360_v42 = vpop.f32.mrb[1].mxu0  ;;  %602 = vst.msk [vmem:[%s1230_s11 + $0x8] sm:$0xff] %vm600_vm1, %v880_v41  ;;  %v521_v43 = vpop.f32.mrb[1].mxu1 }
  0xf6   : > { %439 = vst [vmem:[%s1232_s12] sm:$0xff] %v360_v42  ;;  %601 = vst.msk [vmem:[%s1230_s11] sm:$0xff] %vm600_vm1, %v521_v43 }
  0xf8   : > { %v843_v44 = vpop.f32.mrb[2].mxu0  ;;  %v883_v45 = vpop.f32.mrb[2].mxu1 }
  0xf9   : > { %442 = vst [vmem:[%s1232_s12 + $0x18] sm:$0xff] %v843_v44  ;;  %v370_v46 = vpop.f32.mrb[3].mxu0  ;;  %604 = vst.msk [vmem:[%s1230_s11 + $0x18] sm:$0xff] %vm600_vm1, %v883_v45  ;;  %v531_v47 = vpop.f32.mrb[3].mxu1 }
  0xfa   : > { %441 = vst [vmem:[%s1232_s12 + $0x10] sm:$0xff] %v370_v46  ;;  %603 = vst.msk [vmem:[%s1230_s11 + $0x10] sm:$0xff] %vm600_vm1, %v531_v47 }
  0xfc   : > { %v846_v48 = vpop.f32.mrb[4].mxu0  ;;  %v886_v49 = vpop.f32.mrb[4].mxu1 }
  0xfd   : > { %444 = vst [vmem:[%s1232_s12 + $0x28] sm:$0xff] %v846_v48  ;;  %v380_v50 = vpop.f32.mrb[5].mxu0  ;;  %606 = vst.msk [vmem:[%s1230_s11 + $0x28] sm:$0xff] %vm600_vm1, %v886_v49  ;;  %v541_v51 = vpop.f32.mrb[5].mxu1 }
  0xfe   : > { %443 = vst [vmem:[%s1232_s12 + $0x20] sm:$0xff] %v380_v50  ;;  %605 = vst.msk [vmem:[%s1230_s11 + $0x20] sm:$0xff] %vm600_vm1, %v541_v51 }
 0x100   : > { %v849_v52 = vpop.f32.mrb[6].mxu0  ;;  %v889_v53 = vpop.f32.mrb[6].mxu1 }
 0x101   : > { %446 = vst [vmem:[%s1232_s12 + $0x38] sm:$0xff] %v849_v52  ;;  %v390_v54 = vpop.f32.mrb[7].mxu0  ;;  %608 = vst.msk [vmem:[%s1230_s11 + $0x38] sm:$0xff] %vm600_vm1, %v889_v53  ;;  %v551_v55 = vpop.f32.mrb[7].mxu1 }
 0x102   : > { %445 = vst [vmem:[%s1232_s12 + $0x30] sm:$0xff] %v390_v54  ;;  %607 = vst.msk [vmem:[%s1230_s11 + $0x30] sm:$0xff] %vm600_vm1, %v551_v55 }
 0x104   : > { %v852_v56 = vpop.f32.mrb[8].mxu0  ;;  %v892_v57 = vpop.f32.mrb[8].mxu1 }
 0x105   : > { %448 = vst [vmem:[%s1232_s12 + $0x48] sm:$0xff] %v852_v56  ;;  %v400_v58 = vpop.f32.mrb[9].mxu0  ;;  %610 = vst.msk [vmem:[%s1230_s11 + $0x48] sm:$0xff] %vm600_vm1, %v892_v57  ;;  %v561_v59 = vpop.f32.mrb[9].mxu1 }
 0x106   : > { %447 = vst [vmem:[%s1232_s12 + $0x40] sm:$0xff] %v400_v58  ;;  %609 = vst.msk [vmem:[%s1230_s11 + $0x40] sm:$0xff] %vm600_vm1, %v561_v59 }
 0x108   : > { %v855_v60 = vpop.f32.mrb[10].mxu0  ;;  %v895_v61 = vpop.f32.mrb[10].mxu1 }
 0x109   : > { %450 = vst [vmem:[%s1232_s12 + $0x58] sm:$0xff] %v855_v60  ;;  %v410_v62 = vpop.f32.mrb[11].mxu0  ;;  %612 = vst.msk [vmem:[%s1230_s11 + $0x58] sm:$0xff] %vm600_vm1, %v895_v61  ;;  %v571_v63 = vpop.f32.mrb[11].mxu1 }
 0x10a   : > { %449 = vst [vmem:[%s1232_s12 + $0x50] sm:$0xff] %v410_v62  ;;  %611 = vst.msk [vmem:[%s1230_s11 + $0x50] sm:$0xff] %vm600_vm1, %v571_v63 }
 0x10c   : > { %v858_v0 = vpop.f32.mrb[12].mxu0  ;;  %v898_v1 = vpop.f32.mrb[12].mxu1 }
 0x10d   : > { %452 = vst [vmem:[%s1232_s12 + $0x68] sm:$0xff] %v858_v0  ;;  %v420_v2 = vpop.f32.mrb[13].mxu0  ;;  %614 = vst.msk [vmem:[%s1230_s11 + $0x68] sm:$0xff] %vm600_vm1, %v898_v1  ;;  %v581_v3 = vpop.f32.mrb[13].mxu1 }
 0x10e   : > { %451 = vst [vmem:[%s1232_s12 + $0x60] sm:$0xff] %v420_v2  ;;  %613 = vst.msk [vmem:[%s1230_s11 + $0x60] sm:$0xff] %vm600_vm1, %v581_v3 }
 0x110   : > { %v861_v4 = vpop.f32.mrb[14].mxu0  ;;  %v901_v5 = vpop.f32.mrb[14].mxu1 }
 0x111   : > { %454 = vst [vmem:[%s1232_s12 + $0x78] sm:$0xff] %v861_v4  ;;  %v430_v6 = vpop.f32.mrb[15].mxu0  ;;  %616 = vst.msk [vmem:[%s1230_s11 + $0x78] sm:$0xff] %vm600_vm1, %v901_v5  ;;  %v591_v7 = vpop.f32.mrb[15].mxu1 }
 0x112   : > { %453 = vst [vmem:[%s1232_s12 + $0x70] sm:$0xff] %v430_v6  ;;  %615 = vst.msk [vmem:[%s1230_s11 + $0x70] sm:$0xff] %vm600_vm1, %v591_v7 }
 0x113   : > { %988 = shalt.err (!%p985_p3)
}
 0x114   : > { %s989_s29 = scalar_lea.hbm %s1281_s20, 2048  ;;  %s993_s6 = scalar_lea.hbm %s1337_s3, 4096 }
 0x115   : > { %p990_p4 = scmp.ne.s32.totalorder %s1281_s20, %s989_s29  ;;  %p994_p9 = scmp.lt.u32.totalorder %s1281_s20, %s1337_s3 }
 0x116   : > { %p995_p10 = scmp.lt.u32.totalorder %s993_s6, %s989_s29  ;;  %p997_p12 = scmp.lt.u32.totalorder %s989_s29, %s1281_s20 }
 0x117   : > { %p991_p7 = pnand %p990_p4, %p1105_p5 }
 0x118   : > { %p996_p11 = por %p995_p10, %p994_p9 }
 0x119   : > { %p992_p8 = pneg %p991_p7 }
 0x11a   : > { %p998_p13 = por %p997_p12, %p996_p11 }
 0x11c   : > { %p999_p0 = pnand %p998_p13, %p992_p8 }
 0x11e   : > { %1002 = shalt.err (!%p999_p0)
}
 0x11f   : > { %s1040_s11 = smov 128   ;;  %s1041_s12 = smov 8  }
 0x120   : > { %934 = dma.vmem_to_hbm [thread:$0]  (%p1105_p5), %s1283_s10, 2048, %s1281_s20, %s1293_s19, %s1040_s11, %s1040_s11, %s1041_s12  }
 0x121 PF: > { %p940_p1 = scmp.ge.s32.totalorder %s1037_s18, 2  ;;  %s655_s7 = sand.u32 1, %s1025_s15  }
 0x122   : > { %s656_s13 = scalar_lea.sflag [#allocation3], %s655_s7 }
 0x123   : > { %p937_p2 = pnand %p940_p1, %p1109_p6 }
 0x125   : > { %1020 = dma.done.wait (!%p937_p2), %s656_s13, 2048  }
 0x126   : > { %1022 = vsyncadd (!%p937_p2), %s656_s13, 4294965248  ;;  %p15_p3 = scmp.ge.s32.totalorder %s1092_s21, 4   ;;  %s1341_s15 = smov %s1029_s16 }
 0x127   : > { %s1342_s16 = smov %s1033_s17  ;;  %s1343_s17 = smov %s1103_s24 }
 0x128   : > { %s1344_s18 = smov %s1092_s21  ;;  %17 = sbr.rel (!%p15_p3) target bundleno = 3 (0x3), region = 79 }
 0x12f   :  { %669 = vsyncpa [#allocation3], 1 }
 0x130   :  { %671 = vsyncpa [#allocation3 + $0x1], 1 }

</bundles_post_ra>
